<compile_context>
chip_gen: v7x
topology: tpu7x:2x2x1
jax: 0.10.0
libtpu: 0.0.40
codegen_flags: <defaults>
</compile_context>

<pallas_src>
import jax
import jax.numpy as jnp
from jax.experimental import pallas as pl
from jax.experimental.pallas import tpu as pltpu

IN_CHANNELS = 8
DILATION_FILTERS = 16
KERNEL_SIZE = 3
LAYERS = 3
# Receptive-field shrink of the stacked VALID convolutions: (K-1)*sum(K**l) = 26.
RECEPTIVE = (KERNEL_SIZE - 1) * sum(KERNEL_SIZE ** l for l in range(LAYERS))

_HALO = 128                 # lane-aligned halo block (>= RECEPTIVE)
_SHORT_T_THRESHOLD = 256    # below this, tile over batch instead of time


def _round_up(x, m):
    return -(-x // m) * m


# ----------------------------- kernel bodies ---------------------------------

def _dilated_conv_relu(x, w_ref, b_ref, dilation):
    """x: (C_in, W).  w_ref: (K, C_out, C_in).  b_ref: (C_out, 1) f32.
    Returns only the VALID columns (C_out, W - (K-1)*dilation) in x.dtype.
    One accumulating MXU matmul per tap; no im2col buffer."""
    w_out = x.shape[-1] - (KERNEL_SIZE - 1) * dilation
    acc = None
    for k in range(KERNEL_SIZE):
        tap = x[:, k * dilation: k * dilation + w_out]            # static slice
        p = jnp.dot(w_ref[k], tap, preferred_element_type=jnp.float32)
        acc = p if acc is None else acc + p
    return jnp.maximum(acc + b_ref[...], 0.0).astype(x.dtype)


def _forward_2d(x, wb_refs):
    for layer, (w_ref, b_ref) in enumerate(wb_refs):
        x = _dilated_conv_relu(x, w_ref, b_ref, KERNEL_SIZE ** layer)
    return x


def _kernel_time_tiled(x_ref, halo_ref, w0, b0, w1, b1, w2, b2, o_ref):
    # x_ref: (1, C_in, T_BLK); halo_ref: (1, C_in, 128) = next block's first columns.
    x = jnp.concatenate([x_ref[0], halo_ref[0]], axis=-1)         # (C_in, T_BLK+128)
    h = _forward_2d(x, [(w0, b0), (w1, b1), (w2, b2)])            # (C_out, T_BLK+102)
    t_blk = o_ref.shape[-1]
    o_ref[0] = h[:, :t_blk].astype(o_ref.dtype)


def _kernel_batch_tiled(x_ref, w0, b0, w1, b1, w2, b2, o_ref):
    # x_ref: (B_BLK, C_in, T); o_ref: (B_BLK, C_out, T - RECEPTIVE).
    for b in range(x_ref.shape[0]):
        h = _forward_2d(x_ref[b], [(w0, b0), (w1, b1), (w2, b2)])
        o_ref[b] = h.astype(o_ref.dtype)


# ------------------------------- wrapper --------------------------------------

def _vmem_limit_bytes():
    cap = 64 * 1024 * 1024
    try:
        cap = int(pltpu.get_tpu_info().vmem_capacity_bytes)
    except Exception:
        pass
    # <= ~48 MiB on v7x (64 MiB VMEM per TC), up to 96 MiB on v5e/v6e (128 MiB).
    return max(32 * 1024 * 1024, min((cap * 3) // 4, 96 * 1024 * 1024))


def _const_spec(a):
    zeros = (0,) * a.ndim
    return pl.BlockSpec(a.shape, lambda *args, _z=zeros: _z)


def _pick_time_block(t_out, batch, in_item, out_item, vmem_limit):
    # Rough live bytes per lane: f32 intermediates/taps + double-buffered I/O + margin.
    per_lane = (6 * DILATION_FILTERS * 4
                + 2 * IN_CHANNELS * in_item
                + 2 * DILATION_FILTERS * out_item + 64)
    cap = ((vmem_limit // 2) // per_lane) // 128 * 128
    cap = max(128, min(cap, 64 * 1024))
    if batch == 1 and t_out > 2 * 128:
        # give both v7x TensorCores work even for a single-element batch
        cap = min(cap, _round_up(_round_up(t_out, 2) // 2, 128))
    return min(cap, _round_up(t_out, 128))


def baseline_eeg_encoder(eeg, params, *, t_blk=None, b_blk=None, out_dtype=None):
    """eeg: (B, C_in, T).  params: list of (w (C_out, C_in, K) [PyTorch layout], b (C_out,)).
    MXU operands use eeg.dtype (pass bf16 to halve HBM/VMEM bytes); accumulation is f32."""
    B, c_in, T = eeg.shape
    assert c_in == IN_CHANNELS
    t_out = T - RECEPTIVE
    assert t_out > 0, "input time axis shorter than the receptive field"
    out_dtype = eeg.dtype if out_dtype is None else out_dtype
    in_item = jnp.dtype(eeg.dtype).itemsize
    out_item = jnp.dtype(out_dtype).itemsize
    vmem_limit = _vmem_limit_bytes()

    # Weights: (C_out, C_in, K) -> (K, C_out, C_in) in compute dtype; bias (C_out,1) f32.
    flat = []
    for (w, b) in params:
        flat.append(jnp.transpose(w, (2, 0, 1)).astype(eeg.dtype))
        flat.append(b.reshape(-1, 1).astype(jnp.float32))
    w_specs = [_const_spec(a) for a in flat]

    use_time_tiling = (t_blk is not None) or (T >= _SHORT_T_THRESHOLD)

    if use_time_tiling:
        if t_blk is None:
            t_blk = _pick_time_block(t_out, B, in_item, out_item, vmem_limit)
        assert t_blk % 128 == 0 and t_blk >= 128
        n_t = pl.cdiv(t_out, t_blk)
        mult = t_blk // _HALO
        n128 = pl.cdiv(T, _HALO)   # number of 128-column blocks covering the input

        def x_map(b, t):
            return (b, 0, t)

        def halo_map(b, t):
            # First 128 columns of the NEXT time block; clamped when past the end
            # (in that case no valid output of this block needs the halo).
            return (b, 0, jnp.minimum((t + 1) * mult, n128 - 1))

        # TODO(synk): if profiling on v7x still shows exposed DMA waits, bump the main
        # input spec to pipeline_mode=pl.Buffered(3).
        return pl.pallas_call(
            _kernel_time_tiled,
            out_shape=jax.ShapeDtypeStruct((B, DILATION_FILTERS, t_out), out_dtype),
            grid_spec=pltpu.PrefetchScalarGridSpec(
                num_scalar_prefetch=0,
                grid=(B, n_t),
                in_specs=[pl.BlockSpec((1, c_in, t_blk), x_map),
                          pl.BlockSpec((1, c_in, _HALO), halo_map)] + w_specs,
                out_specs=pl.BlockSpec((1, DILATION_FILTERS, t_blk),
                                       lambda b, t: (b, 0, t)),
            ),
            compiler_params=pltpu.CompilerParams(
                dimension_semantics=("parallel", "parallel"),
                vmem_limit_bytes=vmem_limit,
            ),
        )(eeg, eeg, *flat)

    # Short-T path: tile over batch blocks; whole (short) time axis per step.
    # TODO(synk): for huge batches of very short windows (B >> 1000, T < 128) a
    # lane-packing variant (batch folded onto the lane axis) would amortize the
    # per-step overhead better than the unrolled batch loop used here.
    if b_blk is None:
        b_blk = min(B, 8)
    if B >= 2:
        b_blk = min(b_blk, _round_up(B, 2) // 2)   # >= 2 grid steps for v7x megacore
    b_blk = max(1, int(b_blk))
    n_b = pl.cdiv(B, b_blk)

    return pl.pallas_call(
        _kernel_batch_tiled,
        out_shape=jax.ShapeDtypeStruct((B, DILATION_FILTERS, t_out), out_dtype),
        grid_spec=pltpu.PrefetchScalarGridSpec(
            num_scalar_prefetch=0,
            grid=(n_b,),
            in_specs=[pl.BlockSpec((b_blk, c_in, T), lambda i: (i, 0, 0))] + w_specs,
            out_specs=pl.BlockSpec((b_blk, DILATION_FILTERS, t_out),
                                   lambda i: (i, 0, 0)),
        ),
        compiler_params=pltpu.CompilerParams(
            dimension_semantics=("parallel",),
            vmem_limit_bytes=vmem_limit,
        ),
    )(eeg, *flat)


# --------------------------- params & reference -------------------------------

def init_params(key):
    """Deterministic synthetic parameters, PyTorch Conv1d layout: w (C_out, C_in, K), b (C_out,)."""
    params = []
    for layer in range(LAYERS):
        c_in = IN_CHANNELS if layer == 0 else DILATION_FILTERS
        key, kw, kb = jax.random.split(key, 3)
        bound = 1.0 / jnp.sqrt(c_in * KERNEL_SIZE)
        w = jax.random.uniform(kw, (DILATION_FILTERS, c_in, KERNEL_SIZE),
                               jnp.float32, -bound, bound)
        b = jax.random.uniform(kb, (DILATION_FILTERS,), jnp.float32, -bound, bound)
        params.append((w, b))
    return params


def reference_forward(eeg, params):
    """Pure-JAX reference (lax.conv_general_dilated), matches the PyTorch module."""
    h = eeg
    for layer, (w, b) in enumerate(params):
        h = jax.lax.conv_general_dilated(
            h, w, window_strides=(1,), padding="VALID",
            rhs_dilation=(KERNEL_SIZE ** layer,),
            dimension_numbers=("NCH", "OIH", "NCH"),
        ) + b[None, :, None]
        h = jnp.maximum(h, 0.0)
    return h


if __name__ == "__main__":
    key = jax.random.PRNGKey(0)
    key, kx1, kx2 = jax.random.split(key, 3)
    params = init_params(key)

    # 1) Short-T path (batch-tiled): B=2, T=64 -> output time 38.
    x_short = jax.random.normal(kx1, (2, IN_CHANNELS, 64), jnp.float32)
    out_s = jax.block_until_ready(baseline_eeg_encoder(x_short, params))
    ref_s = reference_forward(x_short, params)
    assert out_s.shape == ref_s.shape == (2, DILATION_FILTERS, 64 - RECEPTIVE)
    assert jnp.allclose(out_s, ref_s, atol=1e-3, rtol=1e-3), "short-T mismatch"

    # 2) Time-tiled path with halo (small forced t_blk so multiple time blocks and the
    #    clamped final halo are exercised): B=2, T=640, t_blk=256.
    x_long = jax.random.normal(kx2, (2, IN_CHANNELS, 640), jnp.float32)
    out_l = jax.block_until_ready(baseline_eeg_encoder(x_long, params, t_blk=256))
    ref_l = reference_forward(x_long, params)
    assert out_l.shape == ref_l.shape == (2, DILATION_FILTERS, 640 - RECEPTIVE)
    assert jnp.allclose(out_l, ref_l, atol=1e-3, rtol=1e-3), "time-tiled mismatch"

    # 3) bf16 activations/weights on the MXU (f32 accumulation), looser tolerance.
    out_b = jax.block_until_ready(
        baseline_eeg_encoder(x_long.astype(jnp.bfloat16), params, t_blk=256,
                             out_dtype=jnp.float32))
    assert jnp.allclose(out_b, ref_l, atol=5e-2, rtol=5e-2), "bf16 mismatch"

    print("KERNEL_OK")
</pallas_src>

<mosaic_0001>
module attributes {stable_mosaic.version = 11 : i64} {
  func.func @_kernel_batch_tiled(%arg0: i32, %arg1: memref<1x8x64xf32, #tpu.memory_space<vmem>>, %arg2: memref<3x16x8xf32, #tpu.memory_space<vmem>>, %arg3: memref<16x1xf32, #tpu.memory_space<vmem>>, %arg4: memref<3x16x16xf32, #tpu.memory_space<vmem>>, %arg5: memref<16x1xf32, #tpu.memory_space<vmem>>, %arg6: memref<3x16x16xf32, #tpu.memory_space<vmem>>, %arg7: memref<16x1xf32, #tpu.memory_space<vmem>>, %arg8: memref<1x16x38xf32, #tpu.memory_space<vmem>>) attributes {dimension_semantics = [#tpu.dimension_semantics<parallel>], iteration_bounds = array<i64: 2>, scalar_prefetch = 0 : i64, scratch_operands = 0 : i64, tpu.core_type = #tpu.core_type<tc>, window_params = [{transform_indices = @transform_0, window_bounds = array<i64: 1, 8, 64>}, {pipeline_mode = #tpu.pipeline_mode<synchronous>, transform_indices = @transform_1, window_bounds = array<i64: 3, 16, 8>}, {pipeline_mode = #tpu.pipeline_mode<synchronous>, transform_indices = @transform_2, window_bounds = array<i64: 16, 1>}, {pipeline_mode = #tpu.pipeline_mode<synchronous>, transform_indices = @transform_3, window_bounds = array<i64: 3, 16, 16>}, {pipeline_mode = #tpu.pipeline_mode<synchronous>, transform_indices = @transform_4, window_bounds = array<i64: 16, 1>}, {pipeline_mode = #tpu.pipeline_mode<synchronous>, transform_indices = @transform_5, window_bounds = array<i64: 3, 16, 16>}, {pipeline_mode = #tpu.pipeline_mode<synchronous>, transform_indices = @transform_6, window_bounds = array<i64: 16, 1>}, {transform_indices = @transform_7, window_bounds = array<i64: 1, 16, 38>}]} {
    %c0 = arith.constant 0 : index
    %c0_0 = arith.constant 0 : index
    %c0_1 = arith.constant 0 : index
    %0 = vector.load %arg1[%c0, %c0_0, %c0_1] : memref<1x8x64xf32, #tpu.memory_space<vmem>>, vector<1x8x64xf32>
    %1 = vector.shape_cast %0 : vector<1x8x64xf32> to vector<8x64xf32>
    %2 = vector.extract_strided_slice %1 {offsets = [0, 0], sizes = [8, 62], strides = [1, 1]} : vector<8x64xf32> to vector<8x62xf32>
    %c0_2 = arith.constant 0 : index
    %c0_3 = arith.constant 0 : index
    %c0_4 = arith.constant 0 : index
    %3 = vector.load %arg2[%c0_2, %c0_3, %c0_4] : memref<3x16x8xf32, #tpu.memory_space<vmem>>, vector<1x16x8xf32>
    %4 = vector.shape_cast %3 : vector<1x16x8xf32> to vector<16x8xf32>
    %cst = arith.constant dense<0.000000e+00> : vector<16x62xf32>
    %5 = tpu.matmul %4, %2, %cst {dimension_numbers = #tpu.dot_dimension_numbers<[1], [0], [0], [1], [0, 0, 1, 1], [], []>} : vector<16x8xf32>, vector<8x62xf32>, vector<16x62xf32> -> vector<16x62xf32>
    %6 = vector.extract_strided_slice %1 {offsets = [0, 1], sizes = [8, 62], strides = [1, 1]} : vector<8x64xf32> to vector<8x62xf32>
    %c1 = arith.constant 1 : index
    %c0_5 = arith.constant 0 : index
    %c0_6 = arith.constant 0 : index
    %7 = vector.load %arg2[%c1, %c0_5, %c0_6] : memref<3x16x8xf32, #tpu.memory_space<vmem>>, vector<1x16x8xf32>
    %8 = vector.shape_cast %7 : vector<1x16x8xf32> to vector<16x8xf32>
    %cst_7 = arith.constant dense<0.000000e+00> : vector<16x62xf32>
    %9 = tpu.matmul %8, %6, %cst_7 {dimension_numbers = #tpu.dot_dimension_numbers<[1], [0], [0], [1], [0, 0, 1, 1], [], []>} : vector<16x8xf32>, vector<8x62xf32>, vector<16x62xf32> -> vector<16x62xf32>
    %10 = arith.addf %5, %9 : vector<16x62xf32>
    %11 = vector.extract_strided_slice %1 {offsets = [0, 2], sizes = [8, 62], strides = [1, 1]} : vector<8x64xf32> to vector<8x62xf32>
    %c2 = arith.constant 2 : index
    %c0_8 = arith.constant 0 : index
    %c0_9 = arith.constant 0 : index
    %12 = vector.load %arg2[%c2, %c0_8, %c0_9] : memref<3x16x8xf32, #tpu.memory_space<vmem>>, vector<1x16x8xf32>
    %13 = vector.shape_cast %12 : vector<1x16x8xf32> to vector<16x8xf32>
    %cst_10 = arith.constant dense<0.000000e+00> : vector<16x62xf32>
    %14 = tpu.matmul %13, %11, %cst_10 {dimension_numbers = #tpu.dot_dimension_numbers<[1], [0], [0], [1], [0, 0, 1, 1], [], []>} : vector<16x8xf32>, vector<8x62xf32>, vector<16x62xf32> -> vector<16x62xf32>
    %15 = arith.addf %10, %14 : vector<16x62xf32>
    %c0_11 = arith.constant 0 : index
    %c0_12 = arith.constant 0 : index
    %16 = vector.load %arg3[%c0_11, %c0_12] : memref<16x1xf32, #tpu.memory_space<vmem>>, vector<16x1xf32>
    %17 = vector.broadcast %16 : vector<16x1xf32> to vector<16x62xf32>
    %18 = arith.addf %15, %17 : vector<16x62xf32>
    %cst_13 = arith.constant 0.000000e+00 : f32
    %19 = vector.broadcast %cst_13 : f32 to vector<16x62xf32>
    %20 = arith.maximumf %18, %19 : vector<16x62xf32>
    %21 = vector.extract_strided_slice %20 {offsets = [0, 0], sizes = [16, 56], strides = [1, 1]} : vector<16x62xf32> to vector<16x56xf32>
    %c0_14 = arith.constant 0 : index
    %c0_15 = arith.constant 0 : index
    %c0_16 = arith.constant 0 : index
    %22 = vector.load %arg4[%c0_14, %c0_15, %c0_16] : memref<3x16x16xf32, #tpu.memory_space<vmem>>, vector<1x16x16xf32>
    %23 = vector.shape_cast %22 : vector<1x16x16xf32> to vector<16x16xf32>
    %cst_17 = arith.constant dense<0.000000e+00> : vector<16x56xf32>
    %24 = tpu.matmul %23, %21, %cst_17 {dimension_numbers = #tpu.dot_dimension_numbers<[1], [0], [0], [1], [0, 0, 1, 1], [], []>} : vector<16x16xf32>, vector<16x56xf32>, vector<16x56xf32> -> vector<16x56xf32>
    %25 = vector.extract_strided_slice %20 {offsets = [0, 3], sizes = [16, 56], strides = [1, 1]} : vector<16x62xf32> to vector<16x56xf32>
    %c1_18 = arith.constant 1 : index
    %c0_19 = arith.constant 0 : index
    %c0_20 = arith.constant 0 : index
    %26 = vector.load %arg4[%c1_18, %c0_19, %c0_20] : memref<3x16x16xf32, #tpu.memory_space<vmem>>, vector<1x16x16xf32>
    %27 = vector.shape_cast %26 : vector<1x16x16xf32> to vector<16x16xf32>
    %cst_21 = arith.constant dense<0.000000e+00> : vector<16x56xf32>
    %28 = tpu.matmul %27, %25, %cst_21 {dimension_numbers = #tpu.dot_dimension_numbers<[1], [0], [0], [1], [0, 0, 1, 1], [], []>} : vector<16x16xf32>, vector<16x56xf32>, vector<16x56xf32> -> vector<16x56xf32>
    %29 = arith.addf %24, %28 : vector<16x56xf32>
    %30 = vector.extract_strided_slice %20 {offsets = [0, 6], sizes = [16, 56], strides = [1, 1]} : vector<16x62xf32> to vector<16x56xf32>
    %c2_22 = arith.constant 2 : index
    %c0_23 = arith.constant 0 : index
    %c0_24 = arith.constant 0 : index
    %31 = vector.load %arg4[%c2_22, %c0_23, %c0_24] : memref<3x16x16xf32, #tpu.memory_space<vmem>>, vector<1x16x16xf32>
    %32 = vector.shape_cast %31 : vector<1x16x16xf32> to vector<16x16xf32>
    %cst_25 = arith.constant dense<0.000000e+00> : vector<16x56xf32>
    %33 = tpu.matmul %32, %30, %cst_25 {dimension_numbers = #tpu.dot_dimension_numbers<[1], [0], [0], [1], [0, 0, 1, 1], [], []>} : vector<16x16xf32>, vector<16x56xf32>, vector<16x56xf32> -> vector<16x56xf32>
    %34 = arith.addf %29, %33 : vector<16x56xf32>
    %c0_26 = arith.constant 0 : index
    %c0_27 = arith.constant 0 : index
    %35 = vector.load %arg5[%c0_26, %c0_27] : memref<16x1xf32, #tpu.memory_space<vmem>>, vector<16x1xf32>
    %36 = vector.broadcast %35 : vector<16x1xf32> to vector<16x56xf32>
    %37 = arith.addf %34, %36 : vector<16x56xf32>
    %cst_28 = arith.constant 0.000000e+00 : f32
    %38 = vector.broadcast %cst_28 : f32 to vector<16x56xf32>
    %39 = arith.maximumf %37, %38 : vector<16x56xf32>
    %40 = vector.extract_strided_slice %39 {offsets = [0, 0], sizes = [16, 38], strides = [1, 1]} : vector<16x56xf32> to vector<16x38xf32>
    %c0_29 = arith.constant 0 : index
    %c0_30 = arith.constant 0 : index
    %c0_31 = arith.constant 0 : index
    %41 = vector.load %arg6[%c0_29, %c0_30, %c0_31] : memref<3x16x16xf32, #tpu.memory_space<vmem>>, vector<1x16x16xf32>
    %42 = vector.shape_cast %41 : vector<1x16x16xf32> to vector<16x16xf32>
    %cst_32 = arith.constant dense<0.000000e+00> : vector<16x38xf32>
    %43 = tpu.matmul %42, %40, %cst_32 {dimension_numbers = #tpu.dot_dimension_numbers<[1], [0], [0], [1], [0, 0, 1, 1], [], []>} : vector<16x16xf32>, vector<16x38xf32>, vector<16x38xf32> -> vector<16x38xf32>
    %44 = vector.extract_strided_slice %39 {offsets = [0, 9], sizes = [16, 38], strides = [1, 1]} : vector<16x56xf32> to vector<16x38xf32>
    %c1_33 = arith.constant 1 : index
    %c0_34 = arith.constant 0 : index
    %c0_35 = arith.constant 0 : index
    %45 = vector.load %arg6[%c1_33, %c0_34, %c0_35] : memref<3x16x16xf32, #tpu.memory_space<vmem>>, vector<1x16x16xf32>
    %46 = vector.shape_cast %45 : vector<1x16x16xf32> to vector<16x16xf32>
    %cst_36 = arith.constant dense<0.000000e+00> : vector<16x38xf32>
    %47 = tpu.matmul %46, %44, %cst_36 {dimension_numbers = #tpu.dot_dimension_numbers<[1], [0], [0], [1], [0, 0, 1, 1], [], []>} : vector<16x16xf32>, vector<16x38xf32>, vector<16x38xf32> -> vector<16x38xf32>
    %48 = arith.addf %43, %47 : vector<16x38xf32>
    %49 = vector.extract_strided_slice %39 {offsets = [0, 18], sizes = [16, 38], strides = [1, 1]} : vector<16x56xf32> to vector<16x38xf32>
    %c2_37 = arith.constant 2 : index
    %c0_38 = arith.constant 0 : index
    %c0_39 = arith.constant 0 : index
    %50 = vector.load %arg6[%c2_37, %c0_38, %c0_39] : memref<3x16x16xf32, #tpu.memory_space<vmem>>, vector<1x16x16xf32>
    %51 = vector.shape_cast %50 : vector<1x16x16xf32> to vector<16x16xf32>
    %cst_40 = arith.constant dense<0.000000e+00> : vector<16x38xf32>
    %52 = tpu.matmul %51, %49, %cst_40 {dimension_numbers = #tpu.dot_dimension_numbers<[1], [0], [0], [1], [0, 0, 1, 1], [], []>} : vector<16x16xf32>, vector<16x38xf32>, vector<16x38xf32> -> vector<16x38xf32>
    %53 = arith.addf %48, %52 : vector<16x38xf32>
    %c0_41 = arith.constant 0 : index
    %c0_42 = arith.constant 0 : index
    %54 = vector.load %arg7[%c0_41, %c0_42] : memref<16x1xf32, #tpu.memory_space<vmem>>, vector<16x1xf32>
    %55 = vector.broadcast %54 : vector<16x1xf32> to vector<16x38xf32>
    %56 = arith.addf %53, %55 : vector<16x38xf32>
    %cst_43 = arith.constant 0.000000e+00 : f32
    %57 = vector.broadcast %cst_43 : f32 to vector<16x38xf32>
    %58 = arith.maximumf %56, %57 : vector<16x38xf32>
    %c0_44 = arith.constant 0 : index
    %c0_45 = arith.constant 0 : index
    %c0_46 = arith.constant 0 : index
    %59 = vector.load %arg8[%c0_44, %c0_45, %c0_46] : memref<1x16x38xf32, #tpu.memory_space<vmem>>, vector<1x16x38xf32>
    %60 = vector.shape_cast %59 : vector<1x16x38xf32> to vector<16x38xf32>
    %61 = vector.shape_cast %58 : vector<16x38xf32> to vector<1x16x38xf32>
    tpu.vector_store %arg8[%c0_44, %c0_45, %c0_46], %61 {strides = array<i32>} : memref<1x16x38xf32, #tpu.memory_space<vmem>>, vector<1x16x38xf32>,
    return
  }
  func.func @transform_0(%arg0: i32) -> (i32, i32, i32) {
    %c0_i32 = arith.constant 0 : i32
    %c0_i32_0 = arith.constant 0 : i32
    %c0_i32_1 = arith.constant 0 : i32
    return %arg0, %c0_i32, %c0_i32_0 : i32, i32, i32
  }
  func.func @transform_1(%arg0: i32) -> (i32, i32, i32) {
    %c0_i32 = arith.constant 0 : i32
    %c0_i32_0 = arith.constant 0 : i32
    %c0_i32_1 = arith.constant 0 : i32
    %c0_i32_2 = arith.constant 0 : i32
    return %c0_i32, %c0_i32_0, %c0_i32_1 : i32, i32, i32
  }
  func.func @transform_2(%arg0: i32) -> (i32, i32) {
    %c0_i32 = arith.constant 0 : i32
    %c0_i32_0 = arith.constant 0 : i32
    %c0_i32_1 = arith.constant 0 : i32
    return %c0_i32, %c0_i32_0 : i32, i32
  }
  func.func @transform_3(%arg0: i32) -> (i32, i32, i32) {
    %c0_i32 = arith.constant 0 : i32
    %c0_i32_0 = arith.constant 0 : i32
    %c0_i32_1 = arith.constant 0 : i32
    %c0_i32_2 = arith.constant 0 : i32
    return %c0_i32, %c0_i32_0, %c0_i32_1 : i32, i32, i32
  }
  func.func @transform_4(%arg0: i32) -> (i32, i32) {
    %c0_i32 = arith.constant 0 : i32
    %c0_i32_0 = arith.constant 0 : i32
    %c0_i32_1 = arith.constant 0 : i32
    return %c0_i32, %c0_i32_0 : i32, i32
  }
  func.func @transform_5(%arg0: i32) -> (i32, i32, i32) {
    %c0_i32 = arith.constant 0 : i32
    %c0_i32_0 = arith.constant 0 : i32
    %c0_i32_1 = arith.constant 0 : i32
    %c0_i32_2 = arith.constant 0 : i32
    return %c0_i32, %c0_i32_0, %c0_i32_1 : i32, i32, i32
  }
  func.func @transform_6(%arg0: i32) -> (i32, i32) {
    %c0_i32 = arith.constant 0 : i32
    %c0_i32_0 = arith.constant 0 : i32
    %c0_i32_1 = arith.constant 0 : i32
    return %c0_i32, %c0_i32_0 : i32, i32
  }
  func.func @transform_7(%arg0: i32) -> (i32, i32, i32) {
    %c0_i32 = arith.constant 0 : i32
    %c0_i32_0 = arith.constant 0 : i32
    %c0_i32_1 = arith.constant 0 : i32
    return %arg0, %c0_i32, %c0_i32_0 : i32, i32, i32
  }
}

</mosaic_0001>

<bundles_post_ra>
// kernel: tpu_custom_call.1
= control target key start
LH: loop header
LB: loop body
LE: loop exit
PB: predicated region body
PF: predicated region fallthrough
CT: control target
= control target key end

     0   :  { %12 = vsyncpa [#allocation3], 0  ;;  %s1879_s0 = inlined_call_operand.hbm [shape: f32[2,8,64], index: 0, kind: input, shape index: {}]   ;;  %s1880_s1 = inlined_call_operand.vmem [shape: f32[3,16,8], index: 1, kind: input, shape index: {}]   ;;  %s1881_s2 = inlined_call_operand.vmem [shape: f32[16,1], index: 2, kind: input, shape index: {}]   ;;  %s1882_s3 = inlined_call_operand.vmem [shape: f32[3,16,16], index: 3, kind: input, shape index: {}]   ;;  %s1883_s4 = inlined_call_operand.vmem [shape: f32[16,1], index: 4, kind: input, shape index: {}]   ;;  %s1884_s5 = inlined_call_operand.vmem [shape: f32[3,16,16], index: 5, kind: input, shape index: {}]   ;;  %s1885_s6 = inlined_call_operand.vmem [shape: f32[16,1], index: 6, kind: input, shape index: {}]   ;;  %s1886_s7 = inlined_call_operand.hbm [shape: f32[2,16,38], index: 7, kind: output, shape index: {}]  }
   0x1   :  { %14 = vsyncpa [#allocation3 + $0x1], 0 }
   0x2   :  { %15 = vsyncpa [#allocation4], 0 }
   0x3   :  { %17 = vsyncpa [#allocation4 + $0x1], 0  ;;  %s1625_s24 = smov 0   ;;  %s1627_s25 = smov 0  }
   0x4   :  { %s1629_s26 = smov 0   ;;  %s1631_s27 = smov 0  }
   0x5 LB: > { %s1646_s28 = sadd.s32 4294967295, %s1572_s27   ;;  %s1229_s29 = sadd.s32 4294967294, %s1572_s27   ;;  %s1572_s27 = sphi %s1631_s27, %s1901_s27   ;;  %s1568_s26 = sphi %s1629_s26, %s1900_s26   ;;  %s1564_s25 = sphi %s1627_s25, %s1899_s25   ;;  %s1560_s24 = sphi %s1625_s24, %s1898_s24  }
   0x6   : > { %s1650_s30 = sadd.s32 1, %s1572_s27   ;;  %s30_s8 = sadd.s32 1, %s1568_s26 }
   0x7   : > { %s27_s9 = ssub.s32 %s1572_s27, %s1650_s30  ;;  %p37_p0 = scmp.ne.s32.totalorder %s1568_s26, %s1564_s25 }
   0x8   : > { %p28_p1 = scmp.eq.s32.totalorder %s27_s9, 0  ;;  %p38_p2 = scmp.eq.s32.totalorder %s1572_s27, 0 }
   0x9   : > { %p43_p3 = scmp.ne.s32.totalorder %s1564_s25, %s1560_s24  ;;  %p44_p4 = scmp.eq.s32.totalorder %s1646_s28, 0 }
   0xa   : > { %s1662_s10 = scalar_select %p28_p1, %s1568_s26, %s30_s8  }
   0xb   : > { %p1664_p5 = por %p38_p2, %p37_p0  ;;  %p1668_p6 = por %p44_p4, %p43_p3 }
   0xc   : > { %p193_p7 = scmp.eq.s32.totalorder %s1646_s28, 1  ;;  %p199_p8 = scmp.eq.s32.totalorder %s1229_s29, 1 }
   0xd   : > { %p1411_p10 = scmp.lt.s32.totalorder %s1572_s27, 2  ;;  %s237_s15 = sand.u32 1, %s1568_s26  }
   0xe   : > { %p1675_p11 = por %p193_p7, %p37_p0  ;;  %p1679_p12 = por %p199_p8, %p43_p3 }
   0xf   : > { %s1233_s16 = sshll.u32 %s1572_s27, 7  ;;  %s1232_s17 = sshll.u32 %s237_s15, 3 }
  0x10   : > { %s1890_s13 = scalar_select %p1675_p11, 1, 0 }
  0x11   : > { %s1891_s14 = scalar_select %p1679_p12, 1, 0 }
  0x12   : > { %s1688_s20 = scalar_lea.hbm %s1879_s0, %s1233_s16  ;;  %s241_s21 = scalar_lea.vmem [#allocation2], %s1232_s17 }
  0x13   : > { %s248_s22 = sshll.u32 %s241_s21, 4  ;;  %p1692_p13 = pnand %p1411_p10, %p1664_p5  ;;  %s1696_s22 = int_to_ptr.vmem [resolvable:$true] %s248_s22 }
  0x14   : > { %s238_s29 = scalar_lea.sflag [#allocation3], %s237_s15  ;;  %s1476_s8 = scalar_lea.hbm %s1688_s20, 128 }
  0x15   : > { %p1477_p2 = scmp.ne.s32.totalorder %s1688_s20, %s1476_s8  ;;  %p1478_p3 = pneg %p1692_p13 }
  0x16   : > { %s1481_s16 = scalar_lea.hbm %s1879_s0, 256  ;;  %p1482_p5 = scmp.lt.u32.totalorder %s1688_s20, %s1879_s0 }
  0x17   : > { %p1479_p4 = pnand %p1478_p3, %p1477_p2  ;;  %p1483_p8 = scmp.lt.u32.totalorder %s1481_s16, %s1476_s8 }
  0x18   : > { %p1485_p9 = scmp.lt.u32.totalorder %s1476_s8, %s1688_s20 }
  0x19   : > { %p1480_p7 = pneg %p1479_p4  ;;  %p1484_p10 = por %p1483_p8, %p1482_p5 }
  0x1b   : > { %p1486_p0 = por %p1485_p9, %p1484_p10 }
  0x1d   : > { %p1487_p1 = pnand %p1486_p0, %p1480_p7 }
  0x1f   : > { %1490 = shalt.err (!%p1487_p1)
}
  0x20   : > { %s1491_s15 = scalar_lea.vmem %s1696_s22, 128  ;;  %s1574_s19 = smov [#allocation2]  }
  0x21   : > { %p1492_p2 = scmp.ne.s32.totalorder %s1696_s22, %s1491_s15  ;;  %s1496_s21 = sshll.u32 %s1574_s19, 4  ;;  %s1497_s21 = int_to_ptr.vmem [resolvable:$false] %s1496_s21 }
  0x22   : > { %s1498_s9 = scalar_lea.vmem %s1497_s21, 256  ;;  %p1499_p11 = scmp.lt.s32.totalorder %s1696_s22, %s1497_s21 }
  0x23   : > { %p1494_p4 = pnand %p1492_p2, %p1478_p3  ;;  %p1500_p5 = scmp.lt.s32.totalorder %s1498_s9, %s1491_s15 }
  0x25   : > { %p1495_p12 = pneg %p1494_p4  ;;  %p1501_p8 = por %p1500_p5, %p1499_p11 }
  0x27   : > { %p1502_p9 = pnand %p1501_p8, %p1495_p12 }
  0x29   : > { %1505 = shalt.err (!%p1502_p9)
}
  0x2a   : > { %1406 = dma.hbm_to_vmem [thread:$0]  (!%p1692_p13), %s1688_s20, 128, %s1696_s22, %s238_s29  }
  0x2b   : > { %p1893_p0 = scmp.lt.s32.totalorder %s1572_s27, 3  ;;  %p1894_p1 = scmp.ge.s32.totalorder %s1572_s27, 1 }
  0x2d   : > { %p254_p3 = pnand %p1894_p1, %p1893_p0 }
  0x2e   : > { %s1730_s8 = sand.u32 (!%p254_p3), 1, %s1564_s25  }
  0x2f   : > { %257 = sbr.rel (%p254_p3) target bundleno = 1128 (0x468), region = 48  ;;  %s1235_s11 = sshll.u32 (!%p254_p3), %s1730_s8, 3 }
  0x30   : > { %s260_s16 = scalar_lea.sflag (!%p254_p3), [#allocation3], %s1730_s8  ;;  %s263_s17 = scalar_lea.vmem (!%p254_p3), [#allocation2], %s1235_s11 }
  0x36   : > { %1551 = dma.done.wait (%p1668_p6), %s260_s16, 128  }
  0x37   : > { %1553 = vsyncadd (%p1668_p6), %s260_s16, 4294967168  ;;  %v1575_v0 = vmov 0   ;;  %vm304_vm0 = vcmask 64512   ;;  %v294_v1 = vld [vmem:[%s263_s17] sm:$0xff]  ;;  %s1576_s18 = smov 127   ;;  %v1237_v4 = vld [vmem:[%s1880_s1 + $0x10] sm:$0xff] }
  0x38   : > { %1454 = vset.pattern.permute.xlu1 %v1575_v0  ;;  %1465 = vset.pattern.permute.xlu0 %v1575_v0  ;;  %v295_v2 = vld [vmem:[%s1880_s1] sm:$0xff]  ;;  %v296_v3 = vld [vmem:[%s1880_s1 + $0x8] sm:$0xff]  ;;  %s1577_s16 = smov 126   ;;  %v1238_v9 = vld [vmem:[%s1880_s1 + $0x18] sm:$0xff]  ;;  %vm585_vm1 = vcmask 130048   ;;  %s1578_s12 = smov 122  }
  0x39   : > { %301 = vrot.lane.b32.xlu0 %v294_v1, %s1576_s18  ;;  %1311 = vmatprep.subr.mxu0 %v294_v1  ;;  %v1243_v5 = vld [vmem:[%s1880_s1 + $0x20] sm:$0xff]  ;;  %v557_v7 = vld [vmem:[%s1881_s2 + $0x8] sm:$0xff]  ;;  %v1247_v21 = vld [vmem:[%s1882_s3 + $0x10] sm:$0xff]  ;;  %s1579_s21 = smov 125   ;;  %s1580_s17 = smov 110   ;;  %vm1139_vm2 = vcmask 310272  }
  0x3a   : > { %1312 = vmatpush3.msra.mxu0 %v294_v1  ;;  %1313 = vmatprep.mubr.msk.f32.mxu0 %vm304_vm0, %v295_v2  ;;  %v556_v6 = vld [vmem:[%s1881_s2] sm:$0xff]  ;;  %v1244_v11 = vld [vmem:[%s1880_s1 + $0x28] sm:$0xff]  ;;  %v1248_v36 = vld [vmem:[%s1882_s3 + $0x18] sm:$0xff]  ;;  %s1581_s20 = smov 119   ;;  %s1236_s23 = sshll.u32 %s1730_s8, 4 }
  0x3b   : > { %1314 = vmatmul.mubr.msk.f32.vlgmr.msra.gmra.mrb[0].mxu0 %vm304_vm0, %v296_v3  ;;  %1308 = vmatprep.mubr.msk.f32.mxu1 %vm304_vm0, %v1237_v4  ;;  %v841_v27 = vld [vmem:[%s1883_s4 + $0x8] sm:$0xff]  ;;  %v840_v28 = vld [vmem:[%s1883_s4] sm:$0xff]  ;;  %v1257_v47 = vld [vmem:[%s1884_s5 + $0x10] sm:$0xff]  ;;  %s293_s29 = scalar_lea.vmem [#allocation5], %s1236_s23  ;;  %s1272_s15 = sshll.u32 %s1646_s28, 8 }
  0x3c   : > { %1318 = vmatprep.mubr.msk.f32.mxu0 %vm304_vm0, %v1243_v5  ;;  %560 = vperm.xlu1 %1454, %v556_v6   ;;  %v572_v37 = vld [vmem:[%s1882_s3] sm:$0xff]  ;;  %v573_v39 = vld [vmem:[%s1882_s3 + $0x8] sm:$0xff]  ;;  %v1258_v62 = vld [vmem:[%s1884_s5 + $0x18] sm:$0xff]  ;;  %s1156_s18 = sshll.u32 %s293_s29, 4  ;;  %s1143_s28 = scalar_lea.sflag [#allocation4], %s1730_s8  ;;  %s1835_s18 = int_to_ptr.vmem [resolvable:$true] %s1156_s18 }
  0x3d   : > { %470 = vrot.lane.b32.xlu0 %v294_v1, %s1577_s16  ;;  %v1253_v40 = vld [vmem:[%s1882_s3 + $0x20] sm:$0xff]  ;;  %v1254_v41 = vld [vmem:[%s1882_s3 + $0x28] sm:$0xff]  ;;  %s1506_s9 = scalar_lea.vmem %s1835_s18, 256  ;;  %p1895_p11 = scmp.ne.s32.totalorder %s1890_s13, 0 }
  0x3e   : > { %v1124_v53 = vld [vmem:[%s1885_s6 + $0x8] sm:$0xff]  ;;  %v1123_v54 = vld [vmem:[%s1885_s6] sm:$0xff]  ;;  %p1507_p6 = scmp.ne.s32.totalorder %s1835_s18, %s1506_s9  ;;  %s1582_s11 = smov [#allocation5]  }
  0x3f   : > { %v856_v63 = vld [vmem:[%s1884_s5] sm:$0xff]  ;;  %v857_v1 = vld [vmem:[%s1884_s5 + $0x8] sm:$0xff]  ;;  %s1510_s16 = sshll.u32 %s1582_s11, 4  ;;  %s1511_s16 = int_to_ptr.vmem [resolvable:$false] %s1510_s16 }
  0x40   : > { %565 = vperm.xlu1 %1454, %v557_v7   ;;  %v1263_v2 = vld [vmem:[%s1884_s5 + $0x20] sm:$0xff]  ;;  %v1264_v3 = vld [vmem:[%s1884_s5 + $0x28] sm:$0xff]  ;;  %p1508_p12 = pnand %p1507_p6, %p1895_p11  ;;  %p1513_p7 = scmp.lt.s32.totalorder %s1835_s18, %s1511_s16 }
  0x42   : > { %p1509_p13 = pneg %p1508_p12 }
  0xab   : > { %v302_v8 = vpop.permute.xlu0 %301 }
  0xac   : > { %1306 = vmatprep.subr.mxu1 %v302_v8 }
  0xad   : > { %1307 = vmatpush3.msra.mxu1 %v302_v8 }
  0xae   : > { %1309 = vmatmul.mubr.msk.f32.vlgmr.msra.gmra.mrb[0].mxu1 %vm304_vm0, %v1238_v9 }
  0xaf   : > { %v471_v10 = vpop.permute.xlu0 %470  ;;  %1325 = vmatprep.mubr.msk.f32.mxu1 %vm585_vm1, %v1247_v21 }
  0xb0   : > { %1316 = vmatprep.subr.mxu0 %v471_v10 }
  0xb1   : > { %1317 = vmatpush3.msra.mxu0 %v471_v10 }
  0xb2   : > { %1319 = vmatmul.mubr.msk.f32.vlgmr.msra.gmra.mrb[0].mxu0 %vm304_vm0, %v1244_v11 }
  0xb3   : > { %1346 = vmatprep.mubr.msk.f32.mxu0 %vm585_vm1, %v1257_v47 }
  0xbb   : > { %v561_v12 = vpop.permute.xlu1 %560 }
  0xbf   : > { %v566_v19 = vpop.permute.xlu1 %565 }
 0x181   : > { %v1310_v13 = vpop.f32.mrb[0].mxu1 }
 0x182   : > { %v377_v14 = vpop.f32.mrb[1].mxu1 }
 0x185   : > { %v1320_v15 = vpop.f32.mrb[0].mxu0 }
 0x186   : > { %v1387_v16 = vadd.f32 %v1320_v15, %v1310_v13  ;;  %v545_v17 = vpop.f32.mrb[1].mxu0 }
 0x187   : > { %v1388_v18 = vadd.f32 %v545_v17, %v377_v14 }
 0x188   : > { %v569_v20 = vadd.f32 %v1387_v16, %v566_v19 }
 0x189   : > { %v568_v22 = vadd.f32 %v1388_v18, %v561_v12 }
 0x18a   : > { %v571_v23 = vmax.f32 %v569_v20, 0.0 }
 0x18b   : > { %v570_v24 = vmax.f32 %v568_v22, 0.0 }
 0x18d   : > { %v1460_v25 = vpack.i.bf16 %v571_v23, %v570_v24  ;;  %v1367_v26 = vpack.c.bf16 %v571_v23, %v570_v24 }
 0x18f   : > { %1461 = vrot.lane.b32.xlu1 %v1460_v25, %s1578_s12  ;;  %1456 = vrot.lane.b32.xlu0 %v1460_v25, %s1579_s21  ;;  %s1833_s21 = scalar_lea.hbm %s1886_s7, %s1272_s15 }
 0x193   : > { %849 = vperm.xlu1 %1454, %v841_v27   ;;  %844 = vperm.xlu0 %1465, %v840_v28  }
 0x201   : > { %v1457_v29 = vpop.permute.xlu0 %1456  ;;  %v1462_v32 = vpop.permute.xlu1 %1461 }
 0x202   : > { %v1459_v30 = vunpack.i.h.bf16 %v1457_v29  ;;  %v1458_v31 = vunpack.i.l.bf16 %v1457_v29  ;;  %v1464_v34 = vunpack.i.h.bf16 %v1462_v32  ;;  %v1463_v35 = vunpack.i.l.bf16 %v1462_v32 }
 0x204   : > { %v1363_v33 = vpack.c.bf16 %v1459_v30, %v1458_v31  ;;  %v1371_v38 = vpack.c.bf16 %v1464_v34, %v1463_v35 }
 0x206   : > { %1364 = vmatprep.subr.bf16.mxu1 %v1363_v33 }
 0x207   : > { %1366 = vmatpush3.bf16.msra.mxu1 %v1363_v33 }
 0x208   : > { %1368 = vmatprep.subr.bf16.mxu1 %v1367_v26 }
 0x20a   : > { %1326 = vmatmul.mubr.msk.f32.vlgmr.msra.gmra.mrb[2].mxu1 %vm585_vm1, %v1248_v36 }
 0x20b   : > { %1370 = vmatpush3.bf16.msra.mxu1 %v1367_v26  ;;  %1332 = vmatprep.mubr.msk.f32.mxu1 %vm585_vm1, %v572_v37 }
 0x20c   : > { %1372 = vmatprep.subr.bf16.mxu1 %v1371_v38 }
 0x212   : > { %1333 = vmatmul.mubr.msk.f32.vlgmr.msra.gmra.mrb[2].mxu1 %vm585_vm1, %v573_v39  ;;  %v845_v42 = vpop.permute.xlu0 %844  ;;  %v850_v43 = vpop.permute.xlu1 %849 }
 0x213   : > { %1374 = vmatpush3.bf16.msra.mxu1 %v1371_v38  ;;  %1339 = vmatprep.mubr.msk.f32.mxu1 %vm585_vm1, %v1253_v40 }
 0x21a   : > { %1340 = vmatmul.mubr.msk.f32.vlgmr.msra.gmra.mrb[2].mxu1 %vm585_vm1, %v1254_v41 }
 0x2ed   : > { %v1341_v44 = vpop.f32.mrb[2].mxu1 }
 0x2ee   : > { %v853_v45 = vadd.f32 %v1341_v44, %v850_v43  ;;  %v829_v46 = vpop.f32.mrb[3].mxu1 }
 0x2ef   : > { %v852_v48 = vadd.f32 %v845_v42, %v829_v46 }
 0x2f0   : > { %v855_v49 = vmax.f32 %v853_v45, 0.0 }
 0x2f1   : > { %v854_v50 = vmax.f32 %v852_v48, 0.0 }
 0x2f3   : > { %v1471_v51 = vpack.i.bf16 %v855_v49, %v854_v50  ;;  %v1379_v52 = vpack.c.bf16 %v855_v49, %v854_v50 }
 0x2f5   : > { %1472 = vrot.lane.b32.xlu0 %v1471_v51, %s1580_s17  ;;  %1467 = vrot.lane.b32.xlu1 %v1471_v51, %s1581_s20  ;;  %s1512_s17 = scalar_lea.vmem %s1511_s16, 512 }
 0x2f6   : > { %p1514_p10 = scmp.lt.s32.totalorder %s1512_s17, %s1506_s9 }
 0x2f8   : > { %p1515_p2 = por %p1514_p10, %p1513_p7 }
 0x2f9   : > { %1132 = vperm.xlu0 %1465, %v1124_v53   ;;  %1127 = vperm.xlu1 %1454, %v1123_v54  }
 0x2fa   : > { %p1516_p4 = pnand %p1515_p2, %p1509_p13 }
 0x367   : > { %v1468_v55 = vpop.permute.xlu1 %1467  ;;  %v1473_v58 = vpop.permute.xlu0 %1472 }
 0x368   : > { %v1470_v56 = vunpack.i.h.bf16 %v1468_v55  ;;  %v1469_v57 = vunpack.i.l.bf16 %v1468_v55  ;;  %v1475_v60 = vunpack.i.h.bf16 %v1473_v58  ;;  %v1474_v61 = vunpack.i.l.bf16 %v1473_v58 }
 0x36a   : > { %v1375_v59 = vpack.c.bf16 %v1470_v56, %v1469_v57  ;;  %v1383_v0 = vpack.c.bf16 %v1475_v60, %v1474_v61 }
 0x36c   : > { %1376 = vmatprep.subr.bf16.mxu0 %v1375_v59 }
 0x36d   : > { %1378 = vmatpush3.bf16.msra.mxu0 %v1375_v59 }
 0x36e   : > { %1380 = vmatprep.subr.bf16.mxu0 %v1379_v52 }
 0x370   : > { %1347 = vmatmul.mubr.msk.f32.vlgmr.msra.gmra.mrb[2].mxu0 %vm585_vm1, %v1258_v62 }
 0x371   : > { %1382 = vmatpush3.bf16.msra.mxu0 %v1379_v52  ;;  %1353 = vmatprep.mubr.msk.f32.mxu0 %vm585_vm1, %v856_v63 }
 0x372   : > { %1384 = vmatprep.subr.bf16.mxu0 %v1383_v0 }
 0x378   : > { %1354 = vmatmul.mubr.msk.f32.vlgmr.msra.gmra.mrb[2].mxu0 %vm585_vm1, %v857_v1  ;;  %v1133_v4 = vpop.permute.xlu0 %1132  ;;  %v1128_v6 = vpop.permute.xlu1 %1127 }
 0x379   : > { %1386 = vmatpush3.bf16.msra.mxu0 %v1383_v0  ;;  %1360 = vmatprep.mubr.msk.f32.mxu0 %vm585_vm1, %v1263_v2 }
 0x380   : > { %1361 = vmatmul.mubr.msk.f32.vlgmr.msra.gmra.mrb[2].mxu0 %vm585_vm1, %v1264_v3 }
 0x453   : > { %v1362_v5 = vpop.f32.mrb[2].mxu0 }
 0x454   : > { %v1136_v7 = vadd.f32 %v1362_v5, %v1133_v4  ;;  %v1112_v8 = vpop.f32.mrb[3].mxu0 }
 0x455   : > { %v1135_v9 = vadd.f32 %v1128_v6, %v1112_v8 }
 0x456   : > { %v1138_v10 = vmax.f32 %v1136_v7, 0.0 }
 0x457   : > { %v1137_v11 = vmax.f32 %v1135_v9, 0.0 }
 0x458   : > { %1141 = vst.msk [vmem:[%s293_s29 + $0x8] sm:$0xff] %vm1139_vm2, %v1138_v10 }
 0x459   : > { %1140 = vst.msk [vmem:[%s293_s29] sm:$0xff] %vm1139_vm2, %v1137_v11 }
 0x45a   : > { %1519 = shalt.err (!%p1516_p4)
}
 0x45b   : > { %s1520_s20 = scalar_lea.hbm %s1833_s21, 256  ;;  %s1524_s29 = scalar_lea.hbm %s1886_s7, 512 }
 0x45c   : > { %p1521_p5 = scmp.ne.s32.totalorder %s1833_s21, %s1520_s20  ;;  %p1525_p0 = scmp.lt.u32.totalorder %s1833_s21, %s1886_s7 }
 0x45d   : > { %p1526_p1 = scmp.lt.u32.totalorder %s1524_s29, %s1520_s20  ;;  %p1528_p6 = scmp.lt.u32.totalorder %s1520_s20, %s1833_s21 }
 0x45e   : > { %p1522_p8 = pnand %p1521_p5, %p1895_p11 }
 0x45f   : > { %p1527_p3 = por %p1526_p1, %p1525_p0 }
 0x460   : > { %p1523_p9 = pneg %p1522_p8 }
 0x461   : > { %p1529_p12 = por %p1528_p6, %p1527_p3 }
 0x463   : > { %p1530_p13 = pnand %p1529_p12, %p1523_p9 }
 0x465   : > { %1533 = shalt.err (!%p1530_p13)
}
 0x466   : > { %s1583_s12 = smov 128   ;;  %s1584_s9 = smov 8  }
 0x467   : > { %1401 = dma.vmem_to_hbm [thread:$0]  (%p1895_p11), %s1835_s18, 256, %s1833_s21, %s1143_s28, %s1583_s12, %s1583_s12, %s1584_s9  }
 0x468 PF: > { %s1171_s11 = sand.u32 1, %s1560_s24   ;;  %p1896_p7 = scmp.ne.s32.totalorder %s1891_s14, 0 }
 0x469   : > { %p1897_p10 = scmp.ge.s32.totalorder %s1572_s27, 2  ;;  %s1172_s16 = scalar_lea.sflag [#allocation4], %s1171_s11 }
 0x46b   : > { %p1408_p2 = pnand %p1897_p10, %p1896_p7 }
 0x46d   : > { %1555 = dma.done.wait (!%p1408_p2), %s1172_s16, 256  }
 0x46e   : > { %1557 = vsyncadd (!%p1408_p2), %s1172_s16, 4294967040  ;;  %p20_p4 = scmp.ge.s32.totalorder %s1650_s30, 4   ;;  %s1898_s24 = smov %s1564_s25 }
 0x46f   : > { %s1899_s25 = smov %s1568_s26  ;;  %s1900_s26 = smov %s1662_s10 }
 0x470   : > { %s1901_s27 = smov %s1650_s30  ;;  %22 = sbr.rel (!%p20_p4) target bundleno = 5 (0x5), region = 99 }
 0x477   :  { %1177 = vsyncpa [#allocation3], 1 }
 0x478   :  { %1179 = vsyncpa [#allocation3 + $0x1], 1 }
 0x479   :  { %1180 = vsyncpa [#allocation4], 1 }
 0x47a   :  { %1182 = vsyncpa [#allocation4 + $0x1], 1 }

</bundles_post_ra>
